<compile_context>
chip_gen: v7x
topology: tpu7x:2x2x1
jax: 0.10.0
libtpu: 0.0.40
codegen_flags: <defaults>
</compile_context>

<pallas_src>
import jax
import jax.numpy as jnp
from jax.experimental import pallas as pl
from jax.experimental.pallas import tpu as pltpu

FOLD = 4               # batch rows folded into one 128-lane output row (4 * 32 = 128)
ROW_ALIGN = 32         # batch padding granularity (folded sublanes stay multiples of 8)
MAX_TILE_ROWS = 32768  # batch rows per grid step (=> 8192 folded rows, ~9 MiB dbl-buffered)


def _ceil_to(x, m):
    return (x + m - 1) // m * m


def _choose_tile_rows(B):
    """Pick the batch tile: as large as possible, but >= 2 grid steps for big
    batches so both v7x TensorCores get work."""
    aligned_b = _ceil_to(B, ROW_ALIGN)
    if aligned_b <= 2 * ROW_ALIGN:
        return aligned_b                       # tiny batch: single full-extent step
    half = _ceil_to(-(-aligned_b // 2), ROW_ALIGN)   # ~B/2, aligned
    return min(MAX_TILE_ROWS, half)


def _mlp_kernel(xf_ref, w1_ref, b1_ref, w2_ref, b2_ref, o_ref):
    # In-kernel bf16 cast of the streamed f32 input (free on the VPU; avoids a
    # separate wrapper-side XLA pass over x).
    x_bf = xf_ref[...].astype(jnp.bfloat16)
    # First layer (folded): (TF, 4*nq) @ (4*nq, 256) -> (TF, 256), f32 accumulate.
    h = jnp.dot(x_bf, w1_ref[...], preferred_element_type=jnp.float32)
    h = jnp.maximum(h + b1_ref[...], 0.0)                  # bias + ReLU in f32
    # Second layer (folded): (TF, 256) @ (256, 128) -> (TF, 128), f32 accumulate.
    out = jnp.dot(h.astype(jnp.bfloat16), w2_ref[...],
                  preferred_element_type=jnp.float32)
    o_ref[...] = (out + b2_ref[...]).astype(o_ref.dtype)   # lane-dense 128-wide store


def prepare_classical_params(w1, b1, w2, b2):
    """Fold the Linear params into block-diagonal kron(I_FOLD, W) form.

    Called ONCE (hoisted out of the forward wrapper per perf review).
    w1: (n_qubits, 64)  b1: (1, 64)   [Linear(n_qubits, 64), weight pre-transposed]
    w2: (64, 32)        b2: (1, 32)   [Linear(64, 32),       weight pre-transposed]
    """
    eye = jnp.eye(FOLD, dtype=jnp.float32)
    w1f = jnp.kron(eye, w1).astype(jnp.bfloat16)   # (FOLD*nq, FOLD*64)
    w2f = jnp.kron(eye, w2).astype(jnp.bfloat16)   # (FOLD*64, FOLD*32) = (256, 128)
    b1f = jnp.tile(b1.reshape(1, -1), (1, FOLD))   # (1, FOLD*64) f32
    b2f = jnp.tile(b2.reshape(1, -1), (1, FOLD))   # (1, FOLD*32) f32
    return w1f, b1f, w2f, b2f


def quantum_ai_model_forward(x, w1f, b1f, w2f, b2f, quantum_weights):
    """Pallas implementation of QuantumAIModel.forward (classical path).

    x: (B, n_qubits) f32.  w1f/b1f/w2f/b2f from prepare_classical_params().
    quantum_weights: unused, see TODO(synk) above.  Returns (B, 32) f32.
    """
    del quantum_weights  # TODO(synk): quantum_layer is undefined in the source module.
    B, nq = x.shape
    h2 = w2f.shape[1] // FOLD                      # 32
    out_lanes = FOLD * h2                          # 128

    # --- batch tiling ---------------------------------------------------------
    tile_rows = _choose_tile_rows(B)
    b_pad = _ceil_to(B, tile_rows)
    grid = (b_pad // tile_rows,)
    tf = tile_rows // FOLD                         # folded rows per grid step

    # --- fold 4 batch rows into one lane-dense row (pure layout plumbing) ------
    # Pad only when needed (padded tail rows compute garbage, sliced off below).
    x_pad = x if b_pad == B else jnp.pad(x, ((0, b_pad - B), (0, 0)))
    xf = x_pad.reshape(b_pad // FOLD, FOLD * nq)   # stays f32; cast happens in-kernel
    n_folded = b_pad // FOLD

    cost = pl.CostEstimate(
        flops=2 * n_folded * (FOLD * nq * w1f.shape[1] + w2f.shape[0] * w2f.shape[1]),
        transcendentals=0,
        bytes_accessed=(xf.size * 4 + n_folded * out_lanes * 4
                        + w1f.size * 2 + w2f.size * 2 + b1f.size * 4 + b2f.size * 4),
    )

    resident = lambda shape: pl.BlockSpec(shape, lambda i: (0, 0))  # VMEM-resident
    out_f = pl.pallas_call(
        _mlp_kernel,
        out_shape=jax.ShapeDtypeStruct((n_folded, out_lanes), jnp.float32),
        grid=grid,
        in_specs=[
            pl.BlockSpec((tf, FOLD * nq), lambda i: (i, 0)),   # streamed f32 input tile
            resident(w1f.shape),
            resident(b1f.shape),
            resident(w2f.shape),
            resident(b2f.shape),
        ],
        out_specs=pl.BlockSpec((tf, out_lanes), lambda i: (i, 0)),
        compiler_params=pltpu.CompilerParams(
            dimension_semantics=("parallel",),     # v7x: grid steps shard across TCs
            vmem_limit_bytes=32 * 1024 * 1024,
        ),
        cost_estimate=cost,
    )(xf, w1f, b1f, w2f, b2f)

    # Unfold back to (B, 32): row-major reshape; slice only if padding was added.
    out = out_f.reshape(b_pad, h2)
    return out if b_pad == B else out[:B]


def init_params(key, n_qubits):
    """Deterministic parameter init matching the PyTorch module's shapes."""
    k1, k2, k3, k4, k5 = jax.random.split(key, 5)
    # nn.Linear(n_qubits, 64): weight (64, n_qubits) -> stored transposed (n_qubits, 64)
    w1 = jax.random.normal(k1, (n_qubits, 64), jnp.float32) * 0.1
    b1 = jax.random.normal(k2, (1, 64), jnp.float32) * 0.01
    # nn.Linear(64, 32): weight (32, 64) -> stored transposed (64, 32)
    w2 = jax.random.normal(k3, (64, 32), jnp.float32) * 0.1
    b2 = jax.random.normal(k4, (1, 32), jnp.float32) * 0.01
    # self.quantum_weights = nn.Parameter(torch.randn(10)) -> kept 2D for TPU layout
    qw = jax.random.normal(k5, (1, 10), jnp.float32)
    return w1, b1, w2, b2, qw


if __name__ == "__main__":
    key = jax.random.PRNGKey(0)
    n_qubits = 4
    batch = 8

    k_x, k_p = jax.random.split(key)
    x = jax.random.normal(k_x, (batch, n_qubits), jnp.float32)
    w1, b1, w2, b2, qw = init_params(k_p, n_qubits)

    # Fold params once (hoisted out of the per-call wrapper).
    w1f, b1f, w2f, b2f = prepare_classical_params(w1, b1, w2, b2)
    w1f, b1f, w2f, b2f = jax.block_until_ready((w1f, b1f, w2f, b2f))

    fwd = jax.jit(quantum_ai_model_forward)
    out = fwd(x, w1f, b1f, w2f, b2f, qw)
    out = jax.block_until_ready(out)

    # Plain-JAX reference of the classical path with matching bf16 MXU rounding.
    xb = x.astype(jnp.bfloat16).astype(jnp.float32)
    w1b = w1.astype(jnp.bfloat16).astype(jnp.float32)
    w2b = w2.astype(jnp.bfloat16).astype(jnp.float32)
    h_ref = jnp.maximum(xb @ w1b + b1, 0.0)
    ref = h_ref.astype(jnp.bfloat16).astype(jnp.float32) @ w2b + b2

    assert out.shape == (batch, 32)
    assert jnp.allclose(out, ref, atol=1e-2, rtol=1e-2), float(jnp.max(jnp.abs(out - ref)))

    print("KERNEL_OK")
</pallas_src>

<mosaic_0001>
module attributes {stable_mosaic.version = 11 : i64} {
  func.func @_mlp_kernel(%arg0: i32, %arg1: memref<8x16xf32, #tpu.memory_space<vmem>>, %arg2: memref<16x256xbf16, #tpu.memory_space<vmem>>, %arg3: memref<1x256xf32, #tpu.memory_space<vmem>>, %arg4: memref<256x128xbf16, #tpu.memory_space<vmem>>, %arg5: memref<1x128xf32, #tpu.memory_space<vmem>>, %arg6: memref<8x128xf32, #tpu.memory_space<vmem>>) attributes {dimension_semantics = [#tpu.dimension_semantics<parallel>], iteration_bounds = array<i64: 1>, scalar_prefetch = 0 : i64, scratch_operands = 0 : i64, tpu.core_type = #tpu.core_type<tc>, window_params = [{transform_indices = @transform_0, window_bounds = array<i64: 8, 16>}, {pipeline_mode = #tpu.pipeline_mode<synchronous>, transform_indices = @transform_1, window_bounds = array<i64: 16, 256>}, {pipeline_mode = #tpu.pipeline_mode<synchronous>, transform_indices = @transform_2, window_bounds = array<i64: 1, 256>}, {pipeline_mode = #tpu.pipeline_mode<synchronous>, transform_indices = @transform_3, window_bounds = array<i64: 256, 128>}, {pipeline_mode = #tpu.pipeline_mode<synchronous>, transform_indices = @transform_4, window_bounds = array<i64: 1, 128>}, {transform_indices = @transform_5, window_bounds = array<i64: 8, 128>}]} {
    %c0 = arith.constant 0 : index
    %c0_0 = arith.constant 0 : index
    %0 = vector.load %arg1[%c0, %c0_0] : memref<8x16xf32, #tpu.memory_space<vmem>>, vector<8x16xf32>
    %1 = arith.truncf %0 : vector<8x16xf32> to vector<8x16xbf16>
    %c0_1 = arith.constant 0 : index
    %c0_2 = arith.constant 0 : index
    %2 = vector.load %arg2[%c0_1, %c0_2] : memref<16x256xbf16, #tpu.memory_space<vmem>>, vector<16x256xbf16>
    %cst = arith.constant dense<0.000000e+00> : vector<8x256xf32>
    %3 = tpu.matmul %1, %2, %cst {dimension_numbers = #tpu.dot_dimension_numbers<[1], [0], [0], [1], [0, 0, 1, 1], [], []>} : vector<8x16xbf16>, vector<16x256xbf16>, vector<8x256xf32> -> vector<8x256xf32>
    %c0_3 = arith.constant 0 : index
    %c0_4 = arith.constant 0 : index
    %4 = vector.load %arg3[%c0_3, %c0_4] : memref<1x256xf32, #tpu.memory_space<vmem>>, vector<1x256xf32>
    %5 = vector.broadcast %4 : vector<1x256xf32> to vector<8x256xf32>
    %6 = arith.addf %3, %5 : vector<8x256xf32>
    %cst_5 = arith.constant 0.000000e+00 : f32
    %7 = vector.broadcast %cst_5 : f32 to vector<8x256xf32>
    %8 = arith.maximumf %6, %7 : vector<8x256xf32>
    %9 = arith.truncf %8 : vector<8x256xf32> to vector<8x256xbf16>
    %c0_6 = arith.constant 0 : index
    %c0_7 = arith.constant 0 : index
    %10 = vector.load %arg4[%c0_6, %c0_7] : memref<256x128xbf16, #tpu.memory_space<vmem>>, vector<256x128xbf16>
    %cst_8 = arith.constant dense<0.000000e+00> : vector<8x128xf32>
    %11 = tpu.matmul %9, %10, %cst_8 {dimension_numbers = #tpu.dot_dimension_numbers<[1], [0], [0], [1], [0, 0, 1, 1], [], []>} : vector<8x256xbf16>, vector<256x128xbf16>, vector<8x128xf32> -> vector<8x128xf32>
    %c0_9 = arith.constant 0 : index
    %c0_10 = arith.constant 0 : index
    %12 = vector.load %arg5[%c0_9, %c0_10] : memref<1x128xf32, #tpu.memory_space<vmem>>, vector<1x128xf32>
    %13 = vector.broadcast %12 : vector<1x128xf32> to vector<8x128xf32>
    %14 = arith.addf %11, %13 : vector<8x128xf32>
    %c0_11 = arith.constant 0 : index
    %c0_12 = arith.constant 0 : index
    %15 = vector.load %arg6[%c0_11, %c0_12] : memref<8x128xf32, #tpu.memory_space<vmem>>, vector<8x128xf32>
    tpu.vector_store %arg6[%c0_11, %c0_12], %14 {strides = array<i32>} : memref<8x128xf32, #tpu.memory_space<vmem>>, vector<8x128xf32>,
    return
  }
  func.func @transform_0(%arg0: i32) -> (i32, i32) {
    %c0_i32 = arith.constant 0 : i32
    %c0_i32_0 = arith.constant 0 : i32
    return %arg0, %c0_i32 : i32, i32
  }
  func.func @transform_1(%arg0: i32) -> (i32, i32) {
    %c0_i32 = arith.constant 0 : i32
    %c0_i32_0 = arith.constant 0 : i32
    %c0_i32_1 = arith.constant 0 : i32
    return %c0_i32, %c0_i32_0 : i32, i32
  }
  func.func @transform_2(%arg0: i32) -> (i32, i32) {
    %c0_i32 = arith.constant 0 : i32
    %c0_i32_0 = arith.constant 0 : i32
    %c0_i32_1 = arith.constant 0 : i32
    return %c0_i32, %c0_i32_0 : i32, i32
  }
  func.func @transform_3(%arg0: i32) -> (i32, i32) {
    %c0_i32 = arith.constant 0 : i32
    %c0_i32_0 = arith.constant 0 : i32
    %c0_i32_1 = arith.constant 0 : i32
    return %c0_i32, %c0_i32_0 : i32, i32
  }
  func.func @transform_4(%arg0: i32) -> (i32, i32) {
    %c0_i32 = arith.constant 0 : i32
    %c0_i32_0 = arith.constant 0 : i32
    %c0_i32_1 = arith.constant 0 : i32
    return %c0_i32, %c0_i32_0 : i32, i32
  }
  func.func @transform_5(%arg0: i32) -> (i32, i32) {
    %c0_i32 = arith.constant 0 : i32
    %c0_i32_0 = arith.constant 0 : i32
    return %arg0, %c0_i32 : i32, i32
  }
}

</mosaic_0001>

<bundles_post_ra>
// kernel: quantum_ai_model_forward.1
= control target key start
LH: loop header
LB: loop body
LE: loop exit
PB: predicated region body
PF: predicated region fallthrough
CT: control target
= control target key end

     0   :  { %10 = vsyncpa [#allocation3], 0  ;;  %s380_s18 = smov [#allocation2]   ;;  %s444_s0 = inlined_call_operand.vmem [shape: f32[8,16], index: 0, kind: input, shape index: {}]   ;;  %s445_s1 = inlined_call_operand.vmem [shape: bf16[16,256], index: 1, kind: input, shape index: {}]   ;;  %s446_s2 = inlined_call_operand.vmem [shape: f32[1,256], index: 2, kind: input, shape index: {}]   ;;  %s447_s3 = inlined_call_operand.hbm [shape: bf16[256,128], index: 3, kind: input, shape index: {}]   ;;  %s448_s4 = inlined_call_operand.vmem [shape: f32[1,128], index: 4, kind: input, shape index: {}]   ;;  %s449_s5 = inlined_call_operand.vmem [shape: f32[8,128], index: 5, kind: output, shape index: {}]  }
   0x1   :  { %s22_s19 = sshll.u32 %s380_s18, 4  ;;  %s356_s22 = scalar_lea.hbm %s447_s3, 2048  ;;  %s23_s19 = int_to_ptr.vmem [resolvable:$true] %s22_s19 }
   0x2   :  { %p357_p0 = scmp.ne.s32.totalorder %s447_s3, %s356_s22  ;;  %p360_p1 = scmp.lt.u32.totalorder %s356_s22, %s447_s3 }
   0x4   :  { %p362_p2 = pnand %p360_p1, %p357_p0 }
   0x6   :  { %365 = shalt.err (!%p362_p2)
}
   0x7   :  { %s366_s27 = scalar_lea.vmem %s23_s19, 2048  ;;  %p371_p4 = scmp.lt.s32.totalorder %s23_s19, %s23_s19 }
   0x8   :  { %p367_p3 = scmp.ne.s32.totalorder %s23_s19, %s366_s27  ;;  %p372_p5 = scmp.lt.s32.totalorder %s366_s27, %s366_s27 }
   0xa   :  { %p373_p6 = por %p372_p5, %p371_p4 }
   0xc   :  { %p374_p7 = pnand %p373_p6, %p367_p3 }
   0xe   :  { %377 = shalt.err (!%p374_p7)
}
   0xf   :  { %s381_s28 = smov 64   ;;  %s382_s29 = smov 4  }
  0x10   :  { %28 = dma.hbm_to_vmem [thread:$0]  %s447_s3, 2048, %s23_s19, [#allocation3], %s381_s28, %s381_s28, %s382_s29  }
  0x11   :  { %378 = dma.done.wait [#allocation3], 2048  }
  0x12   :  { %379 = vsyncadd [#allocation3], 4294965248  ;;  %v383_v0 = vmov 0   ;;  %v337_v1 = vld [vmem:[%s445_s1 + $0x4] ss:$8 sps:$4 sm:$0xff]   ;;  %vm61_vm0 = vcmask 130048   ;;  %v41_v21 = vlaneseq }
  0x13   :  { %97 = vmatprep.mubr.bf16.mxu0 %v383_v0  ;;  %v339_v2 = vld [vmem:[%s445_s1] ss:$8 sps:$4 sm:$0xff]   ;;  %65 = vmatprep.subr.bf16.mxu0 %v337_v1  ;;  %v344_v9 = vld [vmem:[#allocation2 + $0x50] sm:$0xff]   ;;  %v346_v11 = vld [vmem:[#allocation2 + $0x58] sm:$0xff]  }
  0x14   :  { %v35_v3 = vld [vmem:[%s444_s0] sm:$0xff]  ;;  %66 = vmatpush1.bf16.msra.mxu0 %v339_v2  ;;  %v342_v7 = vld [vmem:[#allocation2 + $0x48] sm:$0xff]   ;;  %v345_v10 = vld [vmem:[#allocation2 + $0x10] sm:$0xff]   ;;  %v42_v22 = vshrl.u32 %v41_v21, 7 }
  0x15   :  { %v36_v4 = vpack.c.bf16 %v35_v3, %v35_v3  ;;  %v340_v5 = vld [vmem:[#allocation2 + $0x40] sm:$0xff]   ;;  %v343_v8 = vld [vmem:[#allocation2 + $0x8] sm:$0xff]   ;;  %v347_v12 = vld [vmem:[#allocation2 + $0x18] sm:$0xff]  }
  0x16   :  { %v341_v6 = vld [vmem:[#allocation2] sm:$0xff]   ;;  %311 = vmatprep.subr.bf16.mxu1 %v340_v5  ;;  %v350_v15 = vld [vmem:[#allocation2 + $0x68] sm:$0xff]   ;;  %v352_v17 = vld [vmem:[#allocation2 + $0x70] sm:$0xff]   ;;  %v43_v23 = vsub.s32 0, %v42_v22  ;;  %v47_v25 = vsub.s32 1, %v42_v22 }
  0x17   :  { %312 = vmatpush3.bf16.msra.mxu1 %v341_v6  ;;  %293 = vmatmul.mubr.msk.bf16.vlgmr.msra.gmra.mrb[0].mxu0 %vm61_vm0, %v36_v4  ;;  %v348_v13 = vld [vmem:[#allocation2 + $0x60] sm:$0xff]   ;;  %v351_v16 = vld [vmem:[#allocation2 + $0x28] sm:$0xff]   ;;  %v353_v18 = vld [vmem:[#allocation2 + $0x30] sm:$0xff]  }
  0x18   :  { %313 = vmatprep.subr.bf16.mxu1 %v342_v7  ;;  %v349_v14 = vld [vmem:[#allocation2 + $0x20] sm:$0xff]   ;;  %v354_v19 = vld [vmem:[#allocation2 + $0x78] sm:$0xff]  }
  0x19   :  { %v355_v20 = vld [vmem:[#allocation2 + $0x38] sm:$0xff]   ;;  %v39_v24 = vld [vmem:[%s446_s2] sm:$0x3] }
  0x1a   :  { %v44_v26 = vrot.slane %v39_v24, %v43_v23  ;;  %v48_v27 = vrot.slane %v39_v24, %v47_v25  ;;  %v294_v39 = vld [vmem:[%s448_s4] ss:$0 sm:$0xff] }
  0x1b   :  { %314 = vmatpush3.bf16.msra.mxu1 %v343_v8 }
  0x1c   :  { %315 = vmatprep.subr.bf16.mxu1 %v344_v9 }
  0x1f   :  { %316 = vmatpush3.bf16.msra.mxu1 %v345_v10 }
  0x20   :  { %317 = vmatprep.subr.bf16.mxu1 %v346_v11 }
  0x23   :  { %318 = vmatpush3.bf16.msra.mxu1 %v347_v12 }
  0x24   :  { %319 = vmatprep.subr.bf16.mxu1 %v348_v13 }
  0x27   :  { %320 = vmatpush3.bf16.msra.mxu1 %v349_v14 }
  0x28   :  { %321 = vmatprep.subr.bf16.mxu1 %v350_v15 }
  0x2b   :  { %322 = vmatpush3.bf16.msra.mxu1 %v351_v16 }
  0x2c   :  { %323 = vmatprep.subr.bf16.mxu1 %v352_v17 }
  0x2f   :  { %324 = vmatpush3.bf16.msra.mxu1 %v353_v18 }
  0x30   :  { %325 = vmatprep.subr.bf16.mxu1 %v354_v19 }
  0x33   :  { %326 = vmatpush3.bf16.msra.mxu1 %v355_v20 }
  0xea   :  { %v99_v28 = vpop.f32.mrb[0].mxu0 }
  0xeb   :  { %v100_v29 = vadd.f32 %v99_v28, %v44_v26  ;;  %v101_v30 = vpop.f32.mrb[1].mxu0 }
  0xec   :  { %v102_v31 = vadd.f32 %v101_v30, %v48_v27  ;;  %v103_v32 = vpop.f32.mrb[2].mxu0 }
  0xed   :  { %v106_v33 = vmax.f32 %v100_v29, 0.0  ;;  %v104_v34 = vpop.f32.mrb[3].mxu0 }
  0xee   :  { %v107_v35 = vmax.f32 %v102_v31, 0.0 }
  0xef   :  { %v108_v37 = vpack.c.bf16 %v106_v33, %v106_v33 }
  0xf0   :  { %v109_v36 = vpack.c.bf16 %v107_v35, %v107_v35 }
  0xf2   :  { %277 = vmatprep.mubr.bf16.mxu1 %v109_v36 }
  0xf3   :  { %278 = vmatmul.mubr.bf16.vlgmr.msra.gmra.mrb[0].mxu1 %v108_v37 }
 0x1c6   :  { %v327_v38 = vpop.f32.mrb[0].mxu1 }
 0x1c7   :  { %v328_v40 = vpop.f32.mrb[1].mxu1 }
 0x1c8   :  { %v329_v41 = vadd.f32 %v328_v40, %v327_v38  ;;  %v330_v42 = vpop.f32.mrb[2].mxu1 }
 0x1c9   :  { %v331_v43 = vpop.f32.mrb[3].mxu1 }
 0x1ca   :  { %v280_v44 = vadd.f32 %v329_v41, %v294_v39 }
 0x1cc   :  { %285 = vst [vmem:[%s449_s5] sm:$0xff] %v280_v44 }
 0x1cd   :  { %290 = vsyncpa [#allocation3], 1 }

</bundles_post_ra>
